<compile_context>
chip_gen: v6e
topology: v6e:2x2x1
jax: 0.10.0
libtpu: 0.0.40
codegen_flags: <defaults>
</compile_context>

<pallas_src>
import math
from functools import partial

import jax
import jax.numpy as jnp
from jax.experimental import pallas as pl
from jax.experimental.pallas import tpu as pltpu


def _mha_kernel(q_ref, k_ref, v_ref,
                wq_ref, bq_ref, wk_ref, bk_ref, wv_ref, bv_ref,
                wo_ref, bo_ref,
                out_ref, snn_ref,
                *, heads, d_k):
    # One batch element per grid step; everything stays resident in VMEM.
    q = q_ref[0]                      # (S, D)
    k = k_ref[0]                      # (S, D)
    v = v_ref[0]                      # (S, D)

    # Q/K/V projections: MXU matmuls with fp32 accumulation, plus bias.
    qp = jnp.dot(q, wq_ref[...], preferred_element_type=jnp.float32) + bq_ref[...]
    kp = jnp.dot(k, wk_ref[...], preferred_element_type=jnp.float32) + bk_ref[...]
    vp = jnp.dot(v, wv_ref[...], preferred_element_type=jnp.float32) + bv_ref[...]

    seq = q.shape[0]
    d_model = q.shape[1]
    scale = 1.0 / math.sqrt(d_k)

    snn_sum = jnp.zeros((seq, seq), jnp.float32)
    out_acc = jnp.zeros((seq, d_model), jnp.float32)

    # Static loop over heads: slices are static (aligned to d_k), each head is
    # a pair of small MXU matmuls plus EUP exp/sigmoid and an XLU row-reduce.
    for hh in range(heads):
        lo, hi = hh * d_k, (hh + 1) * d_k
        qh = qp[:, lo:hi]             # (S, d_k)
        kh = kp[:, lo:hi]             # (S, d_k)
        vh = vp[:, lo:hi]             # (S, d_k)

        scores = jnp.dot(qh, kh.T, preferred_element_type=jnp.float32) * scale
        snn_sum = snn_sum + jax.nn.sigmoid(scores)

        # numerically-stable softmax along the key axis
        m = jnp.max(scores, axis=-1, keepdims=True)
        e = jnp.exp(scores - m)
        p = e / jnp.sum(e, axis=-1, keepdims=True)

        oh = jnp.dot(p, vh, preferred_element_type=jnp.float32)   # (S, d_k)
        # concat @ Wo  ==  sum_h  o_h @ Wo[h*d_k:(h+1)*d_k, :]
        out_acc = out_acc + jnp.dot(oh, wo_ref[lo:hi, :],
                                    preferred_element_type=jnp.float32)

    out_ref[0] = (out_acc + bo_ref[...]).astype(out_ref.dtype)
    snn_ref[0] = (snn_sum / heads).astype(snn_ref.dtype)


def multi_head_attention(q, k, v, params, *, heads):
    """q, k, v: (bs, seq, d_model). params: dict of (d_model,d_model) weights
    and (d_model,) biases (x @ W + b convention). Returns (output, snn_mean)."""
    # TODO(synk): optional `mask` argument not implemented (mask=None path only).
    # TODO(synk): dropout is eval-mode identity; train-mode dropout omitted.
    bs, seq, d_model = q.shape
    assert d_model % heads == 0
    d_k = d_model // heads

    wq, bq = params["wq"], params["bq"].reshape(1, d_model)
    wk, bk = params["wk"], params["bk"].reshape(1, d_model)
    wv, bv = params["wv"], params["bv"].reshape(1, d_model)
    wo, bo = params["wo"], params["bo"].reshape(1, d_model)

    batch_spec = pl.BlockSpec((1, seq, d_model), lambda b: (b, 0, 0))
    w_spec = pl.BlockSpec((d_model, d_model), lambda b: (0, 0))
    b_spec = pl.BlockSpec((1, d_model), lambda b: (0, 0))

    out, snn_mean = pl.pallas_call(
        partial(_mha_kernel, heads=heads, d_k=d_k),
        out_shape=(
            jax.ShapeDtypeStruct((bs, seq, d_model), q.dtype),
            jax.ShapeDtypeStruct((bs, seq, seq), jnp.float32),
        ),
        grid_spec=pltpu.PrefetchScalarGridSpec(
            num_scalar_prefetch=0,
            grid=(bs,),
            in_specs=[
                batch_spec, batch_spec, batch_spec,
                w_spec, b_spec,          # Wq, bq
                w_spec, b_spec,          # Wk, bk
                w_spec, b_spec,          # Wv, bv
                w_spec, b_spec,          # Wo, bo
            ],
            out_specs=[
                batch_spec,
                pl.BlockSpec((1, seq, seq), lambda b: (b, 0, 0)),
            ],
        ),
        compiler_params=pltpu.CompilerParams(
            dimension_semantics=("parallel",),
        ),
    )(q, k, v, wq, bq, wk, bk, wv, bv, wo, bo)

    # matches PyTorch: return (output, scores_nn.mean(1).squeeze())
    return out, jnp.squeeze(snn_mean)


if __name__ == "__main__":
    key = jax.random.PRNGKey(0)
    bs, seq, heads, d_model = 2, 8, 4, 32
    d_k = d_model // heads

    keys = jax.random.split(key, 11)
    q = jax.random.normal(keys[0], (bs, seq, d_model), jnp.float32)
    k = jax.random.normal(keys[1], (bs, seq, d_model), jnp.float32)
    v = jax.random.normal(keys[2], (bs, seq, d_model), jnp.float32)

    def init_w(kk):
        return jax.random.normal(kk, (d_model, d_model), jnp.float32) / math.sqrt(d_model)

    params = {
        "wq": init_w(keys[3]), "bq": 0.1 * jax.random.normal(keys[4], (d_model,), jnp.float32),
        "wk": init_w(keys[5]), "bk": 0.1 * jax.random.normal(keys[6], (d_model,), jnp.float32),
        "wv": init_w(keys[7]), "bv": 0.1 * jax.random.normal(keys[8], (d_model,), jnp.float32),
        "wo": init_w(keys[9]), "bo": 0.1 * jax.random.normal(keys[10], (d_model,), jnp.float32),
    }

    out, snn = multi_head_attention(q, k, v, params, heads=heads)
    out, snn = jax.block_until_ready((out, snn))

    # Pure-JAX reference (same math as the PyTorch module, eval mode, mask=None)
    def reference(q, k, v, p):
        qp = q @ p["wq"] + p["bq"]
        kp = k @ p["wk"] + p["bk"]
        vp = v @ p["wv"] + p["bv"]

        def split(x):
            return x.reshape(bs, seq, heads, d_k).transpose(0, 2, 1, 3)

        qh, kh, vh = split(qp), split(kp), split(vp)
        scores = jnp.einsum("bhqd,bhkd->bhqk", qh, kh) / math.sqrt(d_k)
        snn_ref = jax.nn.sigmoid(scores)
        pattn = jax.nn.softmax(scores, axis=-1)
        oh = jnp.einsum("bhqk,bhkd->bhqd", pattn, vh)
        concat = oh.transpose(0, 2, 1, 3).reshape(bs, seq, d_model)
        return concat @ p["wo"] + p["bo"], jnp.squeeze(snn_ref.mean(axis=1))

    out_ref, snn_ref = reference(q, k, v, params)
    assert out.shape == (bs, seq, d_model)
    assert snn.shape == (bs, seq, seq)
    assert jnp.allclose(out, out_ref, atol=1e-4, rtol=1e-4), "output mismatch vs reference"
    assert jnp.allclose(snn, snn_ref, atol=1e-5, rtol=1e-5), "scores_nn mismatch vs reference"

    print("KERNEL_OK")
</pallas_src>

<mosaic_0001>
module attributes {stable_mosaic.version = 11 : i64} {
  func.func @_mha_kernel(%arg0: i32, %arg1: memref<1x8x32xf32, #tpu.memory_space<vmem>>, %arg2: memref<1x8x32xf32, #tpu.memory_space<vmem>>, %arg3: memref<1x8x32xf32, #tpu.memory_space<vmem>>, %arg4: memref<32x32xf32, #tpu.memory_space<vmem>>, %arg5: memref<1x32xf32, #tpu.memory_space<vmem>>, %arg6: memref<32x32xf32, #tpu.memory_space<vmem>>, %arg7: memref<1x32xf32, #tpu.memory_space<vmem>>, %arg8: memref<32x32xf32, #tpu.memory_space<vmem>>, %arg9: memref<1x32xf32, #tpu.memory_space<vmem>>, %arg10: memref<32x32xf32, #tpu.memory_space<vmem>>, %arg11: memref<1x32xf32, #tpu.memory_space<vmem>>, %arg12: memref<1x8x32xf32, #tpu.memory_space<vmem>>, %arg13: memref<1x8x8xf32, #tpu.memory_space<vmem>>) attributes {dimension_semantics = [#tpu.dimension_semantics<parallel>], iteration_bounds = array<i64: 2>, scalar_prefetch = 0 : i64, scratch_operands = 0 : i64, tpu.core_type = #tpu.core_type<tc>, window_params = [{transform_indices = @transform_0, window_bounds = array<i64: 1, 8, 32>}, {transform_indices = @transform_1, window_bounds = array<i64: 1, 8, 32>}, {transform_indices = @transform_2, window_bounds = array<i64: 1, 8, 32>}, {pipeline_mode = #tpu.pipeline_mode<synchronous>, transform_indices = @transform_3, window_bounds = array<i64: 32, 32>}, {pipeline_mode = #tpu.pipeline_mode<synchronous>, transform_indices = @transform_4, window_bounds = array<i64: 1, 32>}, {pipeline_mode = #tpu.pipeline_mode<synchronous>, transform_indices = @transform_5, window_bounds = array<i64: 32, 32>}, {pipeline_mode = #tpu.pipeline_mode<synchronous>, transform_indices = @transform_6, window_bounds = array<i64: 1, 32>}, {pipeline_mode = #tpu.pipeline_mode<synchronous>, transform_indices = @transform_7, window_bounds = array<i64: 32, 32>}, {pipeline_mode = #tpu.pipeline_mode<synchronous>, transform_indices = @transform_8, window_bounds = array<i64: 1, 32>}, {pipeline_mode = #tpu.pipeline_mode<synchronous>, transform_indices = @transform_9, window_bounds = array<i64: 32, 32>}, {pipeline_mode = #tpu.pipeline_mode<synchronous>, transform_indices = @transform_10, window_bounds = array<i64: 1, 32>}, {transform_indices = @transform_11, window_bounds = array<i64: 1, 8, 32>}, {transform_indices = @transform_12, window_bounds = array<i64: 1, 8, 8>}]} {
    %c0 = arith.constant 0 : index
    %c0_0 = arith.constant 0 : index
    %c0_1 = arith.constant 0 : index
    %0 = vector.load %arg1[%c0, %c0_0, %c0_1] : memref<1x8x32xf32, #tpu.memory_space<vmem>>, vector<1x8x32xf32>
    %1 = vector.shape_cast %0 : vector<1x8x32xf32> to vector<8x32xf32>
    %c0_2 = arith.constant 0 : index
    %c0_3 = arith.constant 0 : index
    %c0_4 = arith.constant 0 : index
    %2 = vector.load %arg2[%c0_2, %c0_3, %c0_4] : memref<1x8x32xf32, #tpu.memory_space<vmem>>, vector<1x8x32xf32>
    %3 = vector.shape_cast %2 : vector<1x8x32xf32> to vector<8x32xf32>
    %c0_5 = arith.constant 0 : index
    %c0_6 = arith.constant 0 : index
    %c0_7 = arith.constant 0 : index
    %4 = vector.load %arg3[%c0_5, %c0_6, %c0_7] : memref<1x8x32xf32, #tpu.memory_space<vmem>>, vector<1x8x32xf32>
    %5 = vector.shape_cast %4 : vector<1x8x32xf32> to vector<8x32xf32>
    %c0_8 = arith.constant 0 : index
    %c0_9 = arith.constant 0 : index
    %6 = vector.load %arg4[%c0_8, %c0_9] : memref<32x32xf32, #tpu.memory_space<vmem>>, vector<32x32xf32>
    %cst = arith.constant dense<0.000000e+00> : vector<8x32xf32>
    %7 = tpu.matmul %1, %6, %cst {dimension_numbers = #tpu.dot_dimension_numbers<[1], [0], [0], [1], [0, 0, 1, 1], [], []>} : vector<8x32xf32>, vector<32x32xf32>, vector<8x32xf32> -> vector<8x32xf32>
    %c0_10 = arith.constant 0 : index
    %c0_11 = arith.constant 0 : index
    %8 = vector.load %arg5[%c0_10, %c0_11] : memref<1x32xf32, #tpu.memory_space<vmem>>, vector<1x32xf32>
    %9 = vector.broadcast %8 : vector<1x32xf32> to vector<8x32xf32>
    %10 = arith.addf %7, %9 : vector<8x32xf32>
    %c0_12 = arith.constant 0 : index
    %c0_13 = arith.constant 0 : index
    %11 = vector.load %arg6[%c0_12, %c0_13] : memref<32x32xf32, #tpu.memory_space<vmem>>, vector<32x32xf32>
    %cst_14 = arith.constant dense<0.000000e+00> : vector<8x32xf32>
    %12 = tpu.matmul %3, %11, %cst_14 {dimension_numbers = #tpu.dot_dimension_numbers<[1], [0], [0], [1], [0, 0, 1, 1], [], []>} : vector<8x32xf32>, vector<32x32xf32>, vector<8x32xf32> -> vector<8x32xf32>
    %c0_15 = arith.constant 0 : index
    %c0_16 = arith.constant 0 : index
    %13 = vector.load %arg7[%c0_15, %c0_16] : memref<1x32xf32, #tpu.memory_space<vmem>>, vector<1x32xf32>
    %14 = vector.broadcast %13 : vector<1x32xf32> to vector<8x32xf32>
    %15 = arith.addf %12, %14 : vector<8x32xf32>
    %c0_17 = arith.constant 0 : index
    %c0_18 = arith.constant 0 : index
    %16 = vector.load %arg8[%c0_17, %c0_18] : memref<32x32xf32, #tpu.memory_space<vmem>>, vector<32x32xf32>
    %cst_19 = arith.constant dense<0.000000e+00> : vector<8x32xf32>
    %17 = tpu.matmul %5, %16, %cst_19 {dimension_numbers = #tpu.dot_dimension_numbers<[1], [0], [0], [1], [0, 0, 1, 1], [], []>} : vector<8x32xf32>, vector<32x32xf32>, vector<8x32xf32> -> vector<8x32xf32>
    %c0_20 = arith.constant 0 : index
    %c0_21 = arith.constant 0 : index
    %18 = vector.load %arg9[%c0_20, %c0_21] : memref<1x32xf32, #tpu.memory_space<vmem>>, vector<1x32xf32>
    %19 = vector.broadcast %18 : vector<1x32xf32> to vector<8x32xf32>
    %20 = arith.addf %17, %19 : vector<8x32xf32>
    %cst_22 = arith.constant 0.000000e+00 : f32
    %21 = vector.broadcast %cst_22 : f32 to vector<8x8xf32>
    %cst_23 = arith.constant 0.000000e+00 : f32
    %22 = vector.broadcast %cst_23 : f32 to vector<8x32xf32>
    %23 = vector.extract_strided_slice %10 {offsets = [0, 0], sizes = [8, 8], strides = [1, 1]} : vector<8x32xf32> to vector<8x8xf32>
    %24 = vector.extract_strided_slice %15 {offsets = [0, 0], sizes = [8, 8], strides = [1, 1]} : vector<8x32xf32> to vector<8x8xf32>
    %25 = vector.extract_strided_slice %20 {offsets = [0, 0], sizes = [8, 8], strides = [1, 1]} : vector<8x32xf32> to vector<8x8xf32>
    %26 = tpu.transpose %24, [1, 0] : vector<8x8xf32> -> vector<8x8xf32>
    %cst_24 = arith.constant dense<0.000000e+00> : vector<8x8xf32>
    %27 = tpu.matmul %23, %26, %cst_24 {dimension_numbers = #tpu.dot_dimension_numbers<[1], [0], [0], [1], [0, 0, 1, 1], [], []>} : vector<8x8xf32>, vector<8x8xf32>, vector<8x8xf32> -> vector<8x8xf32>
    %cst_25 = arith.constant 0.353553385 : f32
    %28 = vector.broadcast %cst_25 : f32 to vector<8x8xf32>
    %29 = arith.mulf %27, %28 : vector<8x8xf32>
    %30 = arith.negf %29 : vector<8x8xf32>
    %31 = math.exp %30 : vector<8x8xf32>
    %cst_26 = arith.constant 1.000000e+00 : f32
    %32 = vector.broadcast %cst_26 : f32 to vector<8x8xf32>
    %33 = arith.addf %32, %31 : vector<8x8xf32>
    %34 = arith.divf %32, %33 : vector<8x8xf32>
    %35 = arith.addf %21, %34 : vector<8x8xf32>
    %cst_27 = arith.constant dense<0xFF800000> : vector<8xf32>
    %36 = vector.multi_reduction <maximumf>, %29, %cst_27 [1] : vector<8x8xf32> to vector<8xf32>
    %37 = vector.shape_cast %36 : vector<8xf32> to vector<8x1xf32>
    %38 = vector.broadcast %37 : vector<8x1xf32> to vector<8x8xf32>
    %39 = arith.subf %29, %38 : vector<8x8xf32>
    %40 = math.exp %39 : vector<8x8xf32>
    %cst_28 = arith.constant dense<0.000000e+00> : vector<8xf32>
    %41 = vector.multi_reduction <add>, %40, %cst_28 [1] : vector<8x8xf32> to vector<8xf32>
    %42 = vector.shape_cast %41 : vector<8xf32> to vector<8x1xf32>
    %43 = vector.broadcast %42 : vector<8x1xf32> to vector<8x8xf32>
    %44 = arith.divf %40, %43 : vector<8x8xf32>
    %cst_29 = arith.constant dense<0.000000e+00> : vector<8x8xf32>
    %45 = tpu.matmul %44, %25, %cst_29 {dimension_numbers = #tpu.dot_dimension_numbers<[1], [0], [0], [1], [0, 0, 1, 1], [], []>} : vector<8x8xf32>, vector<8x8xf32>, vector<8x8xf32> -> vector<8x8xf32>
    %c0_30 = arith.constant 0 : index
    %c0_31 = arith.constant 0 : index
    %46 = vector.load %arg10[%c0_30, %c0_31] : memref<32x32xf32, #tpu.memory_space<vmem>>, vector<8x32xf32>
    %cst_32 = arith.constant dense<0.000000e+00> : vector<8x32xf32>
    %47 = tpu.matmul %45, %46, %cst_32 {dimension_numbers = #tpu.dot_dimension_numbers<[1], [0], [0], [1], [0, 0, 1, 1], [], []>} : vector<8x8xf32>, vector<8x32xf32>, vector<8x32xf32> -> vector<8x32xf32>
    %48 = arith.addf %22, %47 : vector<8x32xf32>
    %49 = vector.extract_strided_slice %10 {offsets = [0, 8], sizes = [8, 8], strides = [1, 1]} : vector<8x32xf32> to vector<8x8xf32>
    %50 = vector.extract_strided_slice %15 {offsets = [0, 8], sizes = [8, 8], strides = [1, 1]} : vector<8x32xf32> to vector<8x8xf32>
    %51 = vector.extract_strided_slice %20 {offsets = [0, 8], sizes = [8, 8], strides = [1, 1]} : vector<8x32xf32> to vector<8x8xf32>
    %52 = tpu.transpose %50, [1, 0] : vector<8x8xf32> -> vector<8x8xf32>
    %cst_33 = arith.constant dense<0.000000e+00> : vector<8x8xf32>
    %53 = tpu.matmul %49, %52, %cst_33 {dimension_numbers = #tpu.dot_dimension_numbers<[1], [0], [0], [1], [0, 0, 1, 1], [], []>} : vector<8x8xf32>, vector<8x8xf32>, vector<8x8xf32> -> vector<8x8xf32>
    %cst_34 = arith.constant 0.353553385 : f32
    %54 = vector.broadcast %cst_34 : f32 to vector<8x8xf32>
    %55 = arith.mulf %53, %54 : vector<8x8xf32>
    %56 = arith.negf %55 : vector<8x8xf32>
    %57 = math.exp %56 : vector<8x8xf32>
    %cst_35 = arith.constant 1.000000e+00 : f32
    %58 = vector.broadcast %cst_35 : f32 to vector<8x8xf32>
    %59 = arith.addf %58, %57 : vector<8x8xf32>
    %60 = arith.divf %58, %59 : vector<8x8xf32>
    %61 = arith.addf %35, %60 : vector<8x8xf32>
    %cst_36 = arith.constant dense<0xFF800000> : vector<8xf32>
    %62 = vector.multi_reduction <maximumf>, %55, %cst_36 [1] : vector<8x8xf32> to vector<8xf32>
    %63 = vector.shape_cast %62 : vector<8xf32> to vector<8x1xf32>
    %64 = vector.broadcast %63 : vector<8x1xf32> to vector<8x8xf32>
    %65 = arith.subf %55, %64 : vector<8x8xf32>
    %66 = math.exp %65 : vector<8x8xf32>
    %cst_37 = arith.constant dense<0.000000e+00> : vector<8xf32>
    %67 = vector.multi_reduction <add>, %66, %cst_37 [1] : vector<8x8xf32> to vector<8xf32>
    %68 = vector.shape_cast %67 : vector<8xf32> to vector<8x1xf32>
    %69 = vector.broadcast %68 : vector<8x1xf32> to vector<8x8xf32>
    %70 = arith.divf %66, %69 : vector<8x8xf32>
    %cst_38 = arith.constant dense<0.000000e+00> : vector<8x8xf32>
    %71 = tpu.matmul %70, %51, %cst_38 {dimension_numbers = #tpu.dot_dimension_numbers<[1], [0], [0], [1], [0, 0, 1, 1], [], []>} : vector<8x8xf32>, vector<8x8xf32>, vector<8x8xf32> -> vector<8x8xf32>
    %c8 = arith.constant 8 : index
    %c0_39 = arith.constant 0 : index
    %72 = vector.load %arg10[%c8, %c0_39] : memref<32x32xf32, #tpu.memory_space<vmem>>, vector<8x32xf32>
    %cst_40 = arith.constant dense<0.000000e+00> : vector<8x32xf32>
    %73 = tpu.matmul %71, %72, %cst_40 {dimension_numbers = #tpu.dot_dimension_numbers<[1], [0], [0], [1], [0, 0, 1, 1], [], []>} : vector<8x8xf32>, vector<8x32xf32>, vector<8x32xf32> -> vector<8x32xf32>
    %74 = arith.addf %48, %73 : vector<8x32xf32>
    %75 = vector.extract_strided_slice %10 {offsets = [0, 16], sizes = [8, 8], strides = [1, 1]} : vector<8x32xf32> to vector<8x8xf32>
    %76 = vector.extract_strided_slice %15 {offsets = [0, 16], sizes = [8, 8], strides = [1, 1]} : vector<8x32xf32> to vector<8x8xf32>
    %77 = vector.extract_strided_slice %20 {offsets = [0, 16], sizes = [8, 8], strides = [1, 1]} : vector<8x32xf32> to vector<8x8xf32>
    %78 = tpu.transpose %76, [1, 0] : vector<8x8xf32> -> vector<8x8xf32>
    %cst_41 = arith.constant dense<0.000000e+00> : vector<8x8xf32>
    %79 = tpu.matmul %75, %78, %cst_41 {dimension_numbers = #tpu.dot_dimension_numbers<[1], [0], [0], [1], [0, 0, 1, 1], [], []>} : vector<8x8xf32>, vector<8x8xf32>, vector<8x8xf32> -> vector<8x8xf32>
    %cst_42 = arith.constant 0.353553385 : f32
    %80 = vector.broadcast %cst_42 : f32 to vector<8x8xf32>
    %81 = arith.mulf %79, %80 : vector<8x8xf32>
    %82 = arith.negf %81 : vector<8x8xf32>
    %83 = math.exp %82 : vector<8x8xf32>
    %cst_43 = arith.constant 1.000000e+00 : f32
    %84 = vector.broadcast %cst_43 : f32 to vector<8x8xf32>
    %85 = arith.addf %84, %83 : vector<8x8xf32>
    %86 = arith.divf %84, %85 : vector<8x8xf32>
    %87 = arith.addf %61, %86 : vector<8x8xf32>
    %cst_44 = arith.constant dense<0xFF800000> : vector<8xf32>
    %88 = vector.multi_reduction <maximumf>, %81, %cst_44 [1] : vector<8x8xf32> to vector<8xf32>
    %89 = vector.shape_cast %88 : vector<8xf32> to vector<8x1xf32>
    %90 = vector.broadcast %89 : vector<8x1xf32> to vector<8x8xf32>
    %91 = arith.subf %81, %90 : vector<8x8xf32>
    %92 = math.exp %91 : vector<8x8xf32>
    %cst_45 = arith.constant dense<0.000000e+00> : vector<8xf32>
    %93 = vector.multi_reduction <add>, %92, %cst_45 [1] : vector<8x8xf32> to vector<8xf32>
    %94 = vector.shape_cast %93 : vector<8xf32> to vector<8x1xf32>
    %95 = vector.broadcast %94 : vector<8x1xf32> to vector<8x8xf32>
    %96 = arith.divf %92, %95 : vector<8x8xf32>
    %cst_46 = arith.constant dense<0.000000e+00> : vector<8x8xf32>
    %97 = tpu.matmul %96, %77, %cst_46 {dimension_numbers = #tpu.dot_dimension_numbers<[1], [0], [0], [1], [0, 0, 1, 1], [], []>} : vector<8x8xf32>, vector<8x8xf32>, vector<8x8xf32> -> vector<8x8xf32>
    %c16 = arith.constant 16 : index
    %c0_47 = arith.constant 0 : index
    %98 = vector.load %arg10[%c16, %c0_47] : memref<32x32xf32, #tpu.memory_space<vmem>>, vector<8x32xf32>
    %cst_48 = arith.constant dense<0.000000e+00> : vector<8x32xf32>
    %99 = tpu.matmul %97, %98, %cst_48 {dimension_numbers = #tpu.dot_dimension_numbers<[1], [0], [0], [1], [0, 0, 1, 1], [], []>} : vector<8x8xf32>, vector<8x32xf32>, vector<8x32xf32> -> vector<8x32xf32>
    %100 = arith.addf %74, %99 : vector<8x32xf32>
    %101 = vector.extract_strided_slice %10 {offsets = [0, 24], sizes = [8, 8], strides = [1, 1]} : vector<8x32xf32> to vector<8x8xf32>
    %102 = vector.extract_strided_slice %15 {offsets = [0, 24], sizes = [8, 8], strides = [1, 1]} : vector<8x32xf32> to vector<8x8xf32>
    %103 = vector.extract_strided_slice %20 {offsets = [0, 24], sizes = [8, 8], strides = [1, 1]} : vector<8x32xf32> to vector<8x8xf32>
    %104 = tpu.transpose %102, [1, 0] : vector<8x8xf32> -> vector<8x8xf32>
    %cst_49 = arith.constant dense<0.000000e+00> : vector<8x8xf32>
    %105 = tpu.matmul %101, %104, %cst_49 {dimension_numbers = #tpu.dot_dimension_numbers<[1], [0], [0], [1], [0, 0, 1, 1], [], []>} : vector<8x8xf32>, vector<8x8xf32>, vector<8x8xf32> -> vector<8x8xf32>
    %cst_50 = arith.constant 0.353553385 : f32
    %106 = vector.broadcast %cst_50 : f32 to vector<8x8xf32>
    %107 = arith.mulf %105, %106 : vector<8x8xf32>
    %108 = arith.negf %107 : vector<8x8xf32>
    %109 = math.exp %108 : vector<8x8xf32>
    %cst_51 = arith.constant 1.000000e+00 : f32
    %110 = vector.broadcast %cst_51 : f32 to vector<8x8xf32>
    %111 = arith.addf %110, %109 : vector<8x8xf32>
    %112 = arith.divf %110, %111 : vector<8x8xf32>
    %113 = arith.addf %87, %112 : vector<8x8xf32>
    %cst_52 = arith.constant dense<0xFF800000> : vector<8xf32>
    %114 = vector.multi_reduction <maximumf>, %107, %cst_52 [1] : vector<8x8xf32> to vector<8xf32>
    %115 = vector.shape_cast %114 : vector<8xf32> to vector<8x1xf32>
    %116 = vector.broadcast %115 : vector<8x1xf32> to vector<8x8xf32>
    %117 = arith.subf %107, %116 : vector<8x8xf32>
    %118 = math.exp %117 : vector<8x8xf32>
    %cst_53 = arith.constant dense<0.000000e+00> : vector<8xf32>
    %119 = vector.multi_reduction <add>, %118, %cst_53 [1] : vector<8x8xf32> to vector<8xf32>
    %120 = vector.shape_cast %119 : vector<8xf32> to vector<8x1xf32>
    %121 = vector.broadcast %120 : vector<8x1xf32> to vector<8x8xf32>
    %122 = arith.divf %118, %121 : vector<8x8xf32>
    %cst_54 = arith.constant dense<0.000000e+00> : vector<8x8xf32>
    %123 = tpu.matmul %122, %103, %cst_54 {dimension_numbers = #tpu.dot_dimension_numbers<[1], [0], [0], [1], [0, 0, 1, 1], [], []>} : vector<8x8xf32>, vector<8x8xf32>, vector<8x8xf32> -> vector<8x8xf32>
    %c24 = arith.constant 24 : index
    %c0_55 = arith.constant 0 : index
    %124 = vector.load %arg10[%c24, %c0_55] : memref<32x32xf32, #tpu.memory_space<vmem>>, vector<8x32xf32>
    %cst_56 = arith.constant dense<0.000000e+00> : vector<8x32xf32>
    %125 = tpu.matmul %123, %124, %cst_56 {dimension_numbers = #tpu.dot_dimension_numbers<[1], [0], [0], [1], [0, 0, 1, 1], [], []>} : vector<8x8xf32>, vector<8x32xf32>, vector<8x32xf32> -> vector<8x32xf32>
    %126 = arith.addf %100, %125 : vector<8x32xf32>
    %c0_57 = arith.constant 0 : index
    %c0_58 = arith.constant 0 : index
    %127 = vector.load %arg11[%c0_57, %c0_58] : memref<1x32xf32, #tpu.memory_space<vmem>>, vector<1x32xf32>
    %128 = vector.broadcast %127 : vector<1x32xf32> to vector<8x32xf32>
    %129 = arith.addf %126, %128 : vector<8x32xf32>
    %c0_59 = arith.constant 0 : index
    %c0_60 = arith.constant 0 : index
    %c0_61 = arith.constant 0 : index
    %130 = vector.load %arg12[%c0_59, %c0_60, %c0_61] : memref<1x8x32xf32, #tpu.memory_space<vmem>>, vector<1x8x32xf32>
    %131 = vector.shape_cast %130 : vector<1x8x32xf32> to vector<8x32xf32>
    %132 = vector.shape_cast %129 : vector<8x32xf32> to vector<1x8x32xf32>
    tpu.vector_store %arg12[%c0_59, %c0_60, %c0_61], %132 {strides = array<i32>} : memref<1x8x32xf32, #tpu.memory_space<vmem>>, vector<1x8x32xf32>,
    %cst_62 = arith.constant 4.000000e+00 : f32
    %133 = vector.broadcast %cst_62 : f32 to vector<8x8xf32>
    %134 = arith.divf %113, %133 : vector<8x8xf32>
    %c0_63 = arith.constant 0 : index
    %c0_64 = arith.constant 0 : index
    %c0_65 = arith.constant 0 : index
    %135 = vector.load %arg13[%c0_63, %c0_64, %c0_65] : memref<1x8x8xf32, #tpu.memory_space<vmem>>, vector<1x8x8xf32>
    %136 = vector.shape_cast %135 : vector<1x8x8xf32> to vector<8x8xf32>
    %137 = vector.shape_cast %134 : vector<8x8xf32> to vector<1x8x8xf32>
    tpu.vector_store %arg13[%c0_63, %c0_64, %c0_65], %137 {strides = array<i32>} : memref<1x8x8xf32, #tpu.memory_space<vmem>>, vector<1x8x8xf32>,
    return
  }
  func.func @transform_0(%arg0: i32) -> (i32, i32, i32) {
    %c0_i32 = arith.constant 0 : i32
    %c0_i32_0 = arith.constant 0 : i32
    %c0_i32_1 = arith.constant 0 : i32
    return %arg0, %c0_i32, %c0_i32_0 : i32, i32, i32
  }
  func.func @transform_1(%arg0: i32) -> (i32, i32, i32) {
    %c0_i32 = arith.constant 0 : i32
    %c0_i32_0 = arith.constant 0 : i32
    %c0_i32_1 = arith.constant 0 : i32
    return %arg0, %c0_i32, %c0_i32_0 : i32, i32, i32
  }
  func.func @transform_2(%arg0: i32) -> (i32, i32, i32) {
    %c0_i32 = arith.constant 0 : i32
    %c0_i32_0 = arith.constant 0 : i32
    %c0_i32_1 = arith.constant 0 : i32
    return %arg0, %c0_i32, %c0_i32_0 : i32, i32, i32
  }
  func.func @transform_3(%arg0: i32) -> (i32, i32) {
    %c0_i32 = arith.constant 0 : i32
    %c0_i32_0 = arith.constant 0 : i32
    %c0_i32_1 = arith.constant 0 : i32
    return %c0_i32, %c0_i32_0 : i32, i32
  }
  func.func @transform_4(%arg0: i32) -> (i32, i32) {
    %c0_i32 = arith.constant 0 : i32
    %c0_i32_0 = arith.constant 0 : i32
    %c0_i32_1 = arith.constant 0 : i32
    return %c0_i32, %c0_i32_0 : i32, i32
  }
  func.func @transform_5(%arg0: i32) -> (i32, i32) {
    %c0_i32 = arith.constant 0 : i32
    %c0_i32_0 = arith.constant 0 : i32
    %c0_i32_1 = arith.constant 0 : i32
    return %c0_i32, %c0_i32_0 : i32, i32
  }
  func.func @transform_6(%arg0: i32) -> (i32, i32) {
    %c0_i32 = arith.constant 0 : i32
    %c0_i32_0 = arith.constant 0 : i32
    %c0_i32_1 = arith.constant 0 : i32
    return %c0_i32, %c0_i32_0 : i32, i32
  }
  func.func @transform_7(%arg0: i32) -> (i32, i32) {
    %c0_i32 = arith.constant 0 : i32
    %c0_i32_0 = arith.constant 0 : i32
    %c0_i32_1 = arith.constant 0 : i32
    return %c0_i32, %c0_i32_0 : i32, i32
  }
  func.func @transform_8(%arg0: i32) -> (i32, i32) {
    %c0_i32 = arith.constant 0 : i32
    %c0_i32_0 = arith.constant 0 : i32
    %c0_i32_1 = arith.constant 0 : i32
    return %c0_i32, %c0_i32_0 : i32, i32
  }
  func.func @transform_9(%arg0: i32) -> (i32, i32) {
    %c0_i32 = arith.constant 0 : i32
    %c0_i32_0 = arith.constant 0 : i32
    %c0_i32_1 = arith.constant 0 : i32
    return %c0_i32, %c0_i32_0 : i32, i32
  }
  func.func @transform_10(%arg0: i32) -> (i32, i32) {
    %c0_i32 = arith.constant 0 : i32
    %c0_i32_0 = arith.constant 0 : i32
    %c0_i32_1 = arith.constant 0 : i32
    return %c0_i32, %c0_i32_0 : i32, i32
  }
  func.func @transform_11(%arg0: i32) -> (i32, i32, i32) {
    %c0_i32 = arith.constant 0 : i32
    %c0_i32_0 = arith.constant 0 : i32
    %c0_i32_1 = arith.constant 0 : i32
    return %arg0, %c0_i32, %c0_i32_0 : i32, i32, i32
  }
  func.func @transform_12(%arg0: i32) -> (i32, i32, i32) {
    %c0_i32 = arith.constant 0 : i32
    %c0_i32_0 = arith.constant 0 : i32
    %c0_i32_1 = arith.constant 0 : i32
    return %arg0, %c0_i32, %c0_i32_0 : i32, i32, i32
  }
}

</mosaic_0001>

<bundles_post_ra>
// kernel: tpu_custom_call.1
= control target key start
LH: loop header
LB: loop body
LE: loop exit
PB: predicated region body
PF: predicated region fallthrough
CT: control target
= control target key end

     0   :  { %s3175_s0 = inlined_call_operand.hbm [shape: f32[2,8,32], index: 0, kind: input, shape index: {}]   ;;  %s3176_s1 = inlined_call_operand.hbm [shape: f32[2,8,32], index: 1, kind: input, shape index: {}]   ;;  %s3177_s2 = inlined_call_operand.hbm [shape: f32[2,8,32], index: 2, kind: input, shape index: {}]   ;;  %s3178_s3 = inlined_call_operand.hbm [shape: f32[32,32], index: 3, kind: input, shape index: {}]   ;;  %s3179_s4 = inlined_call_operand.vmem [shape: f32[1,32], index: 4, kind: input, shape index: {}]   ;;  %s3180_s5 = inlined_call_operand.hbm [shape: f32[32,32], index: 5, kind: input, shape index: {}]   ;;  %s3181_s6 = inlined_call_operand.vmem [shape: f32[1,32], index: 6, kind: input, shape index: {}]   ;;  %s3182_s7 = inlined_call_operand.hbm [shape: f32[32,32], index: 7, kind: input, shape index: {}]   ;;  %s3183_s8 = inlined_call_operand.vmem [shape: f32[1,32], index: 8, kind: input, shape index: {}]   ;;  %s3184_s9 = inlined_call_operand.hbm [shape: f32[32,32], index: 9, kind: input, shape index: {}]   ;;  %s3185_s10 = inlined_call_operand.vmem [shape: f32[1,32], index: 10, kind: input, shape index: {}]   ;;  %s3186_s11 = inlined_call_operand.hbm [shape: f32[2,8,32], index: 11, kind: output, shape index: {0}]   ;;  %s3187_s12 = inlined_call_operand.hbm [shape: f32[2,8,8], index: 12, kind: output, shape index: {1}]  }
   0x1   :  { %3209 = sst [smem:[#allocation28_spill]] %s3175_s0 }
   0x2   :  { %3210 = sst [smem:[#allocation29_spill]] %s3176_s1 }
   0x3   :  { %3211 = sst [smem:[#allocation30_spill]] %s3178_s3 }
   0x4   :  { %3212 = sst [smem:[#allocation31_spill]] %s3182_s7 }
   0x5   :  { %3213 = sst [smem:[#allocation32_spill]] %s3185_s10 }
   0x6   :  { %3214 = sst [smem:[#allocation33_spill]] %s3186_s11 }
   0x7   :  { %3215 = sst [smem:[#allocation34_spill]] %s3187_s12 }
   0x8   :  { %18 = vsyncpa [#allocation3], 0 }
   0x9   :  { %20 = vsyncpa [#allocation3 + $0x1], 0 }
   0xa   :  { %21 = vsyncpa [#allocation6], 0 }
   0xb   :  { %23 = vsyncpa [#allocation6 + $0x1], 0 }
   0xc   :  { %24 = vsyncpa [#allocation9], 0 }
   0xd   :  { %25 = vsyncpa [#allocation12], 0 }
   0xe   :  { %26 = vsyncpa [#allocation4], 0 }
   0xf   :  { %28 = vsyncpa [#allocation4 + $0x1], 0 }
  0x10   :  { %29 = vsyncpa [#allocation16], 0 }
  0x11   :  { %31 = vsyncpa [#allocation16 + $0x1], 0  ;;  %s2745_s21 = smov 0   ;;  %s2747_s22 = smov 0  }
  0x12   :  { %s2749_s23 = smov 0   ;;  %s2751_s24 = smov 0  }
  0x13 LB: > { %3216 = sst [smem:[#allocation23_spill]] %s2650_s21  ;;  %s2664_s25 = smov [#allocation8]   ;;  %s2662_s24 = sphi %s2751_s24, %s3254_s24   ;;  %s2658_s23 = sphi %s2749_s23, %s3258_s23   ;;  %s2654_s22 = sphi %s2747_s22, %s3257_s22   ;;  %s2650_s21 = sphi %s2745_s21, %s3256_s21  }
  0x14   : > { %3217 = sst [smem:[#allocation24_spill]] %s2662_s24  ;;  %s352_s26 = sshll.u32 %s2664_s25, 4  ;;  %s353_s26 = int_to_ptr.vmem [resolvable:$true] %s352_s26 }
  0x15   : > { %s2766_s27 = sadd.s32 4294967295, %s2662_s24   ;;  %p2040_p0 = scmp.ge.s32.totalorder %s2662_s24, 1 }
  0x16   : > { %p3201_p1 = scmp.eq.s32.totalorder %s2766_s27, 0  ;;  %p340_p2 = scmp.lt.s32.totalorder %s2662_s24, 3 }
  0x17   : > { %s2665_s29 = smov [#allocation11]   ;;  %s2379_s14 = scalar_lea.vmem %s353_s26, 512 }
  0x18   : > { %p2771_p3 = pnand %p2040_p0, %p340_p2  ;;  %s384_s30 = sshll.u32 %s2665_s29, 4  ;;  %s385_s30 = int_to_ptr.vmem [resolvable:$true] %s384_s30 }
  0x19   : > { %p2380_p8 = scmp.ne.s32.totalorder %s353_s26, %s2379_s14  ;;  %p2387_p11 = scmp.lt.s32.totalorder %s353_s26, %s353_s26 }
  0x1a   : > { %s3218_s28 = scalar_select %p2771_p3, 1, 0 }
  0x1b   : > { %p2253_p5 = pneg %p2771_p3  ;;  %p2388_p12 = scmp.lt.s32.totalorder %s2379_s14, %s2379_s14 }
  0x1d   : > { %p2780_p6 = pnand %p2253_p5, %p3201_p1  ;;  %p2389_p13 = por %p2388_p12, %p2387_p11 }
  0x1f   : > { %s3219_s13 = scalar_select %p2780_p6, 1, 0 }
  0x20   : > { %p3188_p7 = pneg %p2780_p6 }
  0x22   : > { %p2382_p9 = pnand %p2380_p8, %p3188_p7 }
  0x24   : > { %p2383_p10 = pneg %p2382_p9 }
  0x26   : > { %p2390_p0 = pnand %p2389_p13, %p2383_p10 }
  0x28   : > { %2393 = shalt.err (!%p2390_p0)
}
  0x29   : > { %s3189_s15 = smov 128   ;;  %s3191_s16 = smov 8  }
  0x2a   : > { %s3220_s3 = sld [smem:[#allocation30_spill]]  ;;  %s2405_s19 = scalar_lea.vmem %s385_s30, 512 }
  0x2b   : > { %p2406_p2 = scmp.ne.s32.totalorder %s385_s30, %s2405_s19  ;;  %p2413_p9 = scmp.lt.s32.totalorder %s385_s30, %s385_s30 }
  0x2c   : > { %p2414_p10 = scmp.lt.s32.totalorder %s2405_s19, %s2405_s19 }
  0x2d   : > { %p2408_p5 = pnand %p2406_p2, %p3188_p7 }
  0x2e   : > { %p2415_p11 = por %p2414_p10, %p2413_p9 }
  0x2f   : > { %p2409_p8 = pneg %p2408_p5 }
  0x30   : > { %2256 = dma.hbm_to_vmem [thread:$0]  (!%p2780_p6), %s3220_s3, 512, %s353_s26, [#allocation9], %s3189_s15, %s3189_s15, %s3191_s16  }
  0x31   : > { %p2416_p12 = pnand %p2415_p11, %p2409_p8 }
  0x33   : > { %2419 = shalt.err (!%p2416_p12)
}
  0x34   : > { %s3221_s7 = sld [smem:[#allocation31_spill]]  ;;  %s2039_s26 = sadd.s32 4294967294, %s2662_s24  }
  0x35   : > { %s2810_s29 = sadd.s32 1, %s2662_s24   ;;  %s44_s17 = sadd.s32 1, %s2658_s23 }
  0x36   : > { %3222 = sst [smem:[#allocation25_spill]] %s2810_s29  ;;  %s41_s14 = ssub.s32 %s2662_s24, %s2810_s29 }
  0x37   : > { %p42_p13 = scmp.eq.s32.totalorder %s41_s14, 0  ;;  %p51_p0 = scmp.ne.s32.totalorder %s2658_s23, %s2654_s22 }
  0x38   : > { %p52_p2 = scmp.eq.s32.totalorder %s2662_s24, 0  ;;  %p57_p5 = scmp.ne.s32.totalorder %s2654_s22, %s2650_s21 }
  0x39   : > { %s2821_s18 = scalar_select %p42_p13, %s2658_s23, %s44_s17  }
  0x3a   : > { %2262 = dma.hbm_to_vmem [thread:$0]  (!%p2780_p6), %s3221_s7, 512, %s385_s30, [#allocation12], %s3189_s15, %s3189_s15, %s3191_s16  }
  0x3b   : > { %3223 = sst [smem:[#allocation26_spill]] %s2821_s18  ;;  %p53_p8 = por %p52_p2, %p51_p0 }
  0x3c   : > { %p2825_p9 = por %p3201_p1, %p57_p5  ;;  %p301_p10 = scmp.eq.s32.totalorder %s2766_s27, 1 }
  0x3d   : > { %p307_p11 = scmp.eq.s32.totalorder %s2039_s26, 1  ;;  %p2287_p12 = scmp.lt.s32.totalorder %s2662_s24, 2 }
  0x3e   : > { %s3224_s19 = scalar_select %p2825_p9, 1, 0 }
  0x3f   : > { %s3193_s30 = sand.u32 1, %s2658_s23   ;;  %p2832_p4 = por %p301_p10, %p51_p0 }
  0x40   : > { %p2836_p7 = por %p307_p11, %p57_p5  ;;  %s2842_s14 = sshll.u32 %s3193_s30, 3 }
  0x41   : > { %s3225_s20 = scalar_select %p2832_p4, 1, 0 }
  0x42   : > { %s3226_s25 = scalar_select %p2836_p7, 1, 0 }
  0x43   : > { %s2845_s17 = sshll.u32 %s2662_s24, 7  ;;  %p2847_p13 = pnand %p2287_p12, %p53_p8 }
  0x44   : > { %3227 = sst [smem:[#allocation27_spill]] %s3226_s25  ;;  %s435_s26 = sand.u32 1, %s2662_s24  }
  0x45   : > { %s3229_s1 = sld [smem:[#allocation29_spill]]  ;;  %s439_s30 = scalar_lea.vmem [#allocation5], %s2842_s14 }
  0x46   : > { %s446_s18 = sshll.u32 %s439_s30, 4  ;;  %s2668_s29 = smov [#allocation10]   ;;  %s2859_s18 = int_to_ptr.vmem [resolvable:$true] %s446_s18 }
  0x47   : > { %s368_s25 = sshll.u32 %s2668_s29, 4  ;;  %s2861_s21 = scalar_lea.sflag [#allocation6], %s435_s26  ;;  %s369_s25 = int_to_ptr.vmem [resolvable:$true] %s368_s25 }
  0x48   : > { %p2867_p2 = pneg %p2847_p13 }
  0x4a   : > { %s3230_s24 = scalar_select %p2867_p2, 1, 0 }
  0x4b   : > { %s2856_s7 = scalar_lea.hbm %s3229_s1, %s2845_s17  ;;  %s2425_s30 = scalar_lea.hbm %s3229_s1, 256 }
  0x4c   : > { %s2420_s11 = scalar_lea.hbm %s2856_s7, 128  ;;  %p2426_p10 = scmp.lt.s32.totalorder %s2856_s7, %s3229_s1 }
  0x4d   : > { %p2421_p0 = scmp.ne.s32.totalorder %s2856_s7, %s2420_s11  ;;  %p2427_p11 = scmp.lt.s32.totalorder %s2425_s30, %s2420_s11 }
  0x4f   : > { %p2423_p5 = pnand %p2867_p2, %p2421_p0  ;;  %p2428_p12 = por %p2427_p11, %p2426_p10 }
  0x51   : > { %p2424_p8 = pneg %p2423_p5 }
  0x53   : > { %p2429_p1 = pnand %p2428_p12, %p2424_p8 }
  0x55   : > { %2432 = shalt.err (!%p2429_p1)
}
  0x56   : > { %s2433_s29 = scalar_lea.vmem %s2859_s18, 128  ;;  %s2669_s26 = smov [#allocation5]  }
  0x57   : > { %p2434_p7 = scmp.ne.s32.totalorder %s2859_s18, %s2433_s29  ;;  %s2438_s3 = sshll.u32 %s2669_s26, 4  ;;  %s2439_s3 = int_to_ptr.vmem [resolvable:$false] %s2438_s3 }
  0x58   : > { %s2440_s16 = scalar_lea.vmem %s2439_s3, 256  ;;  %p2441_p4 = scmp.lt.s32.totalorder %s2859_s18, %s2439_s3 }
  0x59   : > { %p2436_p0 = pnand %p2434_p7, %p2867_p2  ;;  %p2442_p9 = scmp.lt.s32.totalorder %s2440_s16, %s2433_s29 }
  0x5b   : > { %p2437_p5 = pneg %p2436_p0  ;;  %p2443_p3 = por %p2442_p9, %p2441_p4 }
  0x5d   : > { %p2444_p6 = pnand %p2443_p3, %p2437_p5 }
  0x5f   : > { %2447 = shalt.err (!%p2444_p6)
}
  0x60   : > { %2272 = dma.hbm_to_vmem [thread:$0]  (!%p2847_p13), %s2856_s7, 128, %s2859_s18, %s2861_s21  }
  0x61   : > { %s2459_s10 = scalar_lea.vmem %s369_s25, 512  ;;  %p3231_p7 = scmp.ne.s32.totalorder %s3219_s13, 0 }
  0x62   : > { %p2460_p1 = scmp.ne.s32.totalorder %s369_s25, %s2459_s10  ;;  %p2467_p12 = scmp.lt.s32.totalorder %s369_s25, %s369_s25 }
  0x63   : > { %p3232_p8 = pneg %p3231_p7  ;;  %p2468_p0 = scmp.lt.s32.totalorder %s2459_s10, %s2459_s10 }
  0x65   : > { %p2462_p10 = pnand %p2460_p1, %p3232_p8  ;;  %p2469_p2 = por %p2468_p0, %p2467_p12 }
  0x67   : > { %p2463_p11 = pneg %p2462_p10 }
  0x69   : > { %p2470_p4 = pnand %p2469_p2, %p2463_p11 }
  0x6b   : > { %2473 = shalt.err (!%p2470_p4)
}
  0x6c   : > { %s3233_s11 = smov 8   ;;  %s3234_s12 = smov 128  }
  0x6d   : > { %2259 = dma.hbm_to_vmem [thread:$0]  (!%p3231_p7), %s3180_s5, 512, %s369_s25, [#allocation9], %s3234_s12, %s3234_s12, %s3233_s11  }
  0x6e   : > { %s2670_s7 = smov [#allocation13]   ;;  %p3235_p6 = pmov %p3232_p8 }
  0x6f   : > { %s400_s18 = sshll.u32 %s2670_s7, 4  ;;  %s401_s18 = int_to_ptr.vmem [resolvable:$true] %s400_s18 }
  0x70   : > { %s2485_s26 = scalar_lea.vmem %s401_s18, 512  ;;  %p2493_p5 = scmp.lt.s32.totalorder %s401_s18, %s401_s18 }
  0x71   : > { %p2486_p3 = scmp.ne.s32.totalorder %s401_s18, %s2485_s26  ;;  %p2494_p1 = scmp.lt.s32.totalorder %s2485_s26, %s2485_s26 }
  0x73   : > { %p2488_p9 = pnand %p2486_p3, %p3235_p6  ;;  %p2495_p8 = por %p2494_p1, %p2493_p5 }
  0x75   : > { %p2489_p2 = pneg %p2488_p9 }
  0x77   : > { %p2496_p10 = pnand %p2495_p8, %p2489_p2 }
  0x79   : > { %2499 = shalt.err (!%p2496_p10)
}
  0x7a   : > { %2265 = dma.hbm_to_vmem [thread:$0]  (!%p3231_p7), %s3184_s9, 512, %s401_s18, [#allocation12], %s3234_s12, %s3234_s12, %s3233_s11  }
  0x7b   : > { %s3236_s0 = sld [smem:[#allocation28_spill]]  ;;  %s421_s13 = scalar_lea.vmem [#allocation2], %s2842_s14 }
  0x7c   : > { %s428_s29 = sshll.u32 %s421_s13, 4  ;;  %s3237_s7 = sand.u32 1, %s2658_s23   ;;  %s429_s29 = int_to_ptr.vmem [resolvable:$true] %s428_s29 }
  0x7d   : > { %s418_s26 = scalar_lea.sflag [#allocation3], %s3237_s7  ;;  %p3238_p12 = scmp.ne.s32.totalorder %s3230_s24, 0 }
  0x81   : > { %s2916_s30 = scalar_lea.hbm %s3236_s0, %s2845_s17  ;;  %s2505_s12 = scalar_lea.hbm %s3236_s0, 256 }
  0x82   : > { %s2500_s1 = scalar_lea.hbm %s2916_s30, 128  ;;  %p2506_p7 = scmp.lt.s32.totalorder %s2916_s30, %s3236_s0 }
  0x83   : > { %p2501_p11 = scmp.ne.s32.totalorder %s2916_s30, %s2500_s1  ;;  %p2507_p3 = scmp.lt.s32.totalorder %s2505_s12, %s2500_s1 }
  0x85   : > { %p2503_p0 = pnand %p2501_p11, %p3238_p12  ;;  %p2508_p6 = por %p2507_p3, %p2506_p7 }
  0x87   : > { %p2504_p4 = pneg %p2503_p0 }
  0x89   : > { %p2509_p9 = pnand %p2508_p6, %p2504_p4 }
  0x8b   : > { %2512 = shalt.err (!%p2509_p9)
}
  0x8c   : > { %s2513_s16 = scalar_lea.vmem %s429_s29, 128  ;;  %s2671_s10 = smov [#allocation2]  }
  0x8d   : > { %p2514_p2 = scmp.ne.s32.totalorder %s429_s29, %s2513_s16  ;;  %s2518_s13 = sshll.u32 %s2671_s10, 4  ;;  %s2519_s13 = int_to_ptr.vmem [resolvable:$false] %s2518_s13 }
  0x8e   : > { %s2520_s7 = scalar_lea.vmem %s2519_s13, 256  ;;  %p2521_p8 = scmp.lt.s32.totalorder %s429_s29, %s2519_s13 }
  0x8f   : > { %p2516_p5 = pnand %p2514_p2, %p3238_p12  ;;  %p2522_p10 = scmp.lt.s32.totalorder %s2520_s7, %s2513_s16 }
  0x91   : > { %p2517_p1 = pneg %p2516_p5  ;;  %p2523_p11 = por %p2522_p10, %p2521_p8 }
  0x93   : > { %p2524_p0 = pnand %p2523_p11, %p2517_p1 }
  0x95   : > { %2527 = shalt.err (!%p2524_p0)
}
  0x96   : > { %2269 = dma.hbm_to_vmem [thread:$0]  (!%p2847_p13), %s2916_s30, 128, %s429_s29, %s418_s26  }
  0x97   : > { %s462_s11 = scalar_lea.hbm %s3177_s2, %s2845_s17  ;;  %s457_s12 = scalar_lea.vmem [#allocation7], %s2842_s14 }
  0x98   : > { %s464_s18 = sshll.u32 %s457_s12, 4  ;;  %s2528_s3 = scalar_lea.hbm %s462_s11, 128  ;;  %s465_s18 = int_to_ptr.vmem [resolvable:$true] %s464_s18 }
  0x99   : > { %p2529_p4 = scmp.ne.s32.totalorder %s462_s11, %s2528_s3  ;;  %s2533_s13 = scalar_lea.hbm %s3177_s2, 256 }
  0x9a   : > { %p2534_p6 = scmp.lt.s32.totalorder %s462_s11, %s3177_s2  ;;  %p2535_p9 = scmp.lt.s32.totalorder %s2533_s13, %s2528_s3 }
  0x9b   : > { %p2531_p7 = pnand %p2529_p4, %p3238_p12 }
  0x9c   : > { %p2536_p2 = por %p2535_p9, %p2534_p6 }
  0x9d   : > { %p2532_p3 = pneg %p2531_p7 }
  0x9f   : > { %p2537_p5 = pnand %p2536_p2, %p2532_p3 }
  0xa1   : > { %2540 = shalt.err (!%p2537_p5)
}
  0xa2   : > { %s2541_s14 = scalar_lea.vmem %s465_s18, 128  ;;  %s2672_s17 = smov [#allocation7]  }
  0xa3   : > { %p2542_p1 = scmp.ne.s32.totalorder %s465_s18, %s2541_s14  ;;  %s2546_s30 = sshll.u32 %s2672_s17, 4  ;;  %s2547_s30 = int_to_ptr.vmem [resolvable:$false] %s2546_s30 }
  0xa4   : > { %s2548_s29 = scalar_lea.vmem %s2547_s30, 256  ;;  %p2549_p11 = scmp.lt.s32.totalorder %s465_s18, %s2547_s30 }
  0xa5   : > { %p2544_p8 = pnand %p2542_p1, %p3238_p12  ;;  %p2550_p0 = scmp.lt.s32.totalorder %s2548_s29, %s2541_s14 }
  0xa7   : > { %p2545_p10 = pneg %p2544_p8  ;;  %p2551_p4 = por %p2550_p0, %p2549_p11 }
  0xa9   : > { %p2552_p7 = pnand %p2551_p4, %p2545_p10 }
  0xab   : > { %2555 = shalt.err (!%p2552_p7)
}
  0xac   : > { %2275 = dma.hbm_to_vmem [thread:$0]  (!%p2847_p13), %s462_s11, 128, %s465_s18, %s2861_s21  }
  0xad   : > { %p3239_p3 = scmp.ne.s32.totalorder %s3218_s28, 0 }
  0xae   : > { %s2958_s0 = sand.u32 (!%p3239_p3), 1, %s2654_s22   ;;  %p3240_p12 = scmp.ne.s32.totalorder (!%p3239_p3), %s3224_s19, 0 }
  0xaf   : > { %473 = sbr.rel (%p3239_p3) target bundleno = 2640 (0xa50), region = 64  ;;  %s2961_s24 = sshll.u32 (!%p3239_p3), %s2958_s0, 3 }
  0xb0   : > { %s476_s26 = scalar_lea.sflag (!%p3239_p3), [#allocation3], %s2958_s0  ;;  %s479_s1 = scalar_lea.vmem (!%p3239_p3), [#allocation2], %s2961_s24 }
  0xb4   : > { %2625 = dma.done.wait (%p3240_p12), %s476_s26, 128  }
  0xb5   : > { %2627 = vsyncadd (%p3240_p12), %s476_s26, 4294967168  ;;  %s484_s21 = sand.u32 1, %s2766_s27   ;;  %s488_s15 = scalar_lea.vmem [#allocation5], %s2961_s24 }
  0xb6   : > { %s485_s28 = scalar_lea.sflag [#allocation6], %s484_s21 }
  0xb7   : > { %2629 = dma.done.wait (%p3240_p12), %s485_s28, 256  }
  0xb8   : > { %2631 = vsyncadd (%p3240_p12), %s485_s28, 4294967040  ;;  %s497_s25 = scalar_lea.vmem [#allocation7], %s2961_s24  ;;  %p3241_p13 = scmp.eq.s32.totalorder %s2766_s27, 0 }
  0xba   : > { %2633 = dma.done.wait (%p3241_p13), [#allocation9], 1024   ;;  %p3242_p6 = pmov %p3241_p13 }
  0xbc   : > { %2635 = vsyncadd (%p3242_p6), [#allocation9], 4294966272  ;;  %p3243_p9 = pmov %p3242_p6 }
  0xbd   : > { %p3244_p2 = pmov %p3242_p6 }
  0xbe   : > { %2637 = dma.done.wait (%p3243_p9), [#allocation12], 1024  }
  0xbf   : > { %2639 = vsyncadd (%p3244_p2), [#allocation12], 4294966272  ;;  %v2673_v0 = vmov 0.0   ;;  %vm2674_vm0 = vmmov 0   ;;  %v660_v1 = vld [vmem:[#allocation10 + $0x18] sm:$0xff]  ;;  %v659_v3 = vld [vmem:[#allocation10 + $0x10] sm:$0xff] }
  0xc0   : > { %2145 = vmatprep.subr.mxu1 %v2673_v0  ;;  %2134 = vmatprep.subr.mxu0 %v2673_v0  ;;  %v575_v2 = vld [vmem:[#allocation8 + $0x18] sm:$0xff]  ;;  %v574_v4 = vld [vmem:[#allocation8 + $0x10] sm:$0xff]  ;;  %v658_v5 = vld [vmem:[#allocation10 + $0x8] sm:$0xff]  ;;  %vm583_vm1 = vcmask 261120   ;;  %vm825_vm2 = vcmask 64512   ;;  %s2675_s3 = smov 120  }
  0xc1   : > { %2153 = vmatprep.mubr.msk.f32.mxu1 %vm2674_vm0, %v2673_v0  ;;  %2142 = vmatprep.mubr.msk.f32.mxu0 %vm2674_vm0, %v2673_v0  ;;  %v573_v6 = vld [vmem:[#allocation8 + $0x8] sm:$0xff]  ;;  %v657_v7 = vld [vmem:[#allocation10] sm:$0xff]  ;;  %v569_v10 = vld [vmem:[%s479_s1] sm:$0xff]  ;;  %s2676_s13 = smov 112   ;;  %s2677_s7 = smov 104  }
  0xc2   : > { %2146 = vmatpush3.msra.mxu1 %v660_v1  ;;  %2135 = vmatpush3.msra.mxu0 %v575_v2  ;;  %v572_v8 = vld [vmem:[#allocation8] sm:$0xff]  ;;  %v744_v11 = vld [vmem:[#allocation11 + $0x18] sm:$0xff]  ;;  %v743_v12 = vld [vmem:[#allocation11 + $0x10] sm:$0xff]  ;;  %s568_s14 = scalar_lea.vmem [#allocation15], %s2961_s24  ;;  %s2091_s17 = sshll.u32 %s2766_s27, 7 }
  0xc3   : > { %2147 = vmatprep.subr.mxu1 %v2673_v0  ;;  %2136 = vmatprep.subr.mxu0 %v2673_v0  ;;  %v570_v9 = vld [vmem:[%s488_s15] sm:$0xff]  ;;  %v571_v15 = vld [vmem:[%s497_s25] sm:$0xff]  ;;  %s3245_s26 = sld [smem:[#allocation34_spill]]  ;;  %s1856_s21 = sshll.u32 %s568_s14, 4  ;;  %s1857_s21 = int_to_ptr.vmem [resolvable:$true] %s1856_s21 }
  0xc4   : > { %2148 = vmatpush3.msra.mxu1 %v659_v3  ;;  %2137 = vmatpush3.msra.mxu0 %v574_v4  ;;  %v742_v13 = vld [vmem:[#allocation11 + $0x8] sm:$0xff]  ;;  %v741_v14 = vld [vmem:[#allocation11] sm:$0xff]  ;;  %v2064_v16 = vld [vmem:[%s3181_s6] ss:$0 sm:$0xff]  ;;  %s1830_s28 = scalar_lea.sflag [#allocation16], %s2958_s0  ;;  %s2556_s15 = scalar_lea.vmem %s1857_s21, 128 }
  0xc5   : > { %2149 = vmatprep.subr.mxu1 %v2673_v0  ;;  %2138 = vmatprep.subr.mxu0 %v2673_v0  ;;  %v2062_v17 = vld [vmem:[%s3179_s4] ss:$0 sm:$0xff]  ;;  %v1169_v62 = vld [vmem:[#allocation13 + $0x8] sm:$0xff]  ;;  %v994_v4 = vld [vmem:[#allocation13] sm:$0xff]  ;;  %p2557_p5 = scmp.ne.s32.totalorder %s1857_s21, %s2556_s15  ;;  %p3246_p1 = scmp.ne.s32.totalorder %s3225_s20, 0 }
  0xc6   : > { %2150 = vmatpush3.msra.mxu1 %v658_v5  ;;  %2139 = vmatpush3.msra.mxu0 %v573_v6  ;;  %v2066_v24 = vld [vmem:[%s3183_s8] ss:$0 sm:$0xff]  ;;  %s2678_s25 = smov [#allocation15]  }
  0xc7   : > { %2151 = vmatprep.subr.mxu1 %v2673_v0  ;;  %2140 = vmatprep.subr.mxu0 %v2673_v0  ;;  %p2558_p8 = pnand %p2557_p5, %p3246_p1  ;;  %s2560_s19 = sshll.u32 %s2678_s25, 4  ;;  %s2561_s19 = int_to_ptr.vmem [resolvable:$false] %s2560_s19 }
  0xc8   : > { %2152 = vmatpush3.msra.mxu1 %v657_v7  ;;  %2141 = vmatpush3.msra.mxu0 %v572_v8  ;;  %s2562_s11 = scalar_lea.vmem %s2561_s19, 256  ;;  %p2563_p11 = scmp.lt.s32.totalorder %s1857_s21, %s2561_s19 }
  0xc9   : > { %2154 = vmatmul.mubr.msk.f32.vlgmr.msra.gmra.mxu1 %vm583_vm1, %v570_v9  ;;  %2143 = vmatmul.mubr.msk.f32.vlgmr.msra.gmra.mxu0 %vm583_vm1, %v569_v10  ;;  %s1854_s1 = scalar_lea.hbm %s3245_s26, %s2091_s17  ;;  %p2559_p10 = pneg %p2558_p8 }
  0xca   : > { %2167 = vmatprep.subr.mxu1 %v2673_v0  ;;  %2169 = vmatprep.mubr.msk.f32.mxu1 %vm2674_vm0, %v2673_v0  ;;  %p2564_p0 = scmp.lt.s32.totalorder %s2562_s11, %s2556_s15 }
  0xcb   : > { %2156 = vmatprep.subr.mxu0 %v2673_v0  ;;  %2164 = vmatprep.mubr.msk.f32.mxu0 %vm2674_vm0, %v2673_v0 }
  0xcc   : > { %2157 = vmatpush3.msra.mxu0 %v744_v11  ;;  %p2565_p4 = por %p2564_p0, %p2563_p11 }
  0xcd   : > { %2158 = vmatprep.subr.mxu0 %v2673_v0 }
  0xce   : > { %2159 = vmatpush3.msra.mxu0 %v743_v12  ;;  %p2566_p7 = pnand %p2565_p4, %p2559_p10 }
  0xcf   : > { %2160 = vmatprep.subr.mxu0 %v2673_v0 }
  0xd0   : > { %2161 = vmatpush3.msra.mxu0 %v742_v13 }
  0xd1   : > { %2162 = vmatprep.subr.mxu0 %v2673_v0 }
  0xd2   : > { %2163 = vmatpush3.msra.mxu0 %v741_v14 }
  0xd3   : > { %2165 = vmatmul.mubr.msk.f32.vlgmr.msra.gmra.mxu0 %vm583_vm1, %v571_v15  ;;  %2177 = vmatprep.subr.mxu0 %v2673_v0 }
  0xd4   : > { %2179 = vmatprep.mubr.msk.f32.mxu0 %vm2674_vm0, %v2673_v0 }
 0x189   : > { %v737_v18 = vpop.f32.mrf.mxu1  ;;  %v653_v19 = vpop.f32.mrf.mxu0 }
 0x18a   : > { %v3023_v20 = vadd.f32 %v2064_v16, %v737_v18  ;;  %v3025_v21 = vadd.f32 %v2062_v17, %v653_v19 }
 0x18b   : > { %v2155_v22 = vpop.f32.mrf.mxu1  ;;  %v2144_v23 = vpop.f32.mrf.mxu0 }
 0x18c   : > { %997 = vrot.lane.b32.xlu0 %v3023_v20, %s2675_s3  ;;  %2168 = vmatpush3.xpose.msk.msra.mxu1 %vm825_vm2, %v3023_v20 }
 0x18d   : > { %2172 = vmatprep.subr.mxu1 %v2673_v0 }
 0x18f   : > { %2170 = vmatmul.mubr.msk.f32.vlgmr.msra.gmra.mxu1 %vm825_vm2, %v3025_v21 }
 0x190   : > { %995 = vrot.lane.b32.xlu0 %v3025_v21, %s2675_s3  ;;  %2174 = vmatprep.mubr.msk.f32.mxu1 %vm2674_vm0, %v2673_v0 }
 0x193   : > { %v821_v25 = vpop.f32.mrf.mxu0 }
 0x194   : > { %v3041_v26 = vadd.f32 %v2066_v24, %v821_v25 }
 0x195   : > { %v2166_v27 = vpop.f32.mrf.mxu0 }
 0x196   : > { %2173 = vmatpush3.msra.mxu1 %v3041_v26 }
 0x197   : > { %2182 = vmatprep.subr.mxu1 %v2673_v0 }
 0x1fe   : > { %v998_v28 = vpop.permute.xlu0 %997 }
 0x1ff   : > { %2178 = vmatpush3.xpose.msk.msra.mxu0 %vm825_vm2, %v998_v28 }
 0x200   : > { %2187 = vmatprep.subr.mxu0 %v2673_v0 }
 0x202   : > { %v996_v29 = vpop.permute.xlu0 %995 }
 0x203   : > { %2180 = vmatmul.mubr.msk.f32.vlgmr.msra.gmra.mxu0 %vm825_vm2, %v996_v29 }
 0x204   : > { %2189 = vmatprep.mubr.msk.f32.mxu0 %vm2674_vm0, %v2673_v0  ;;  %2188 = vmatpush3.msra.mxu0 %v1169_v62 }
 0x205   : > { %2197 = vmatprep.subr.mxu0 %v2673_v0 }
 0x24f   : > { %v898_v30 = vpop.f32.mrf.mxu1 }
 0x250   : > { %v902_v31 = vmul.f32 0.35355338, %v898_v30  ;;  %v2070_v34 = vmul.f32 -0.35355338, %v898_v30 }
 0x251   : > { %v2171_v32 = vpop.f32.mrf.mxu1 }
 0x252   : > { %v910_v33 = vsel %vm825_vm2, %v902_v31, -inf  ;;  %v904_v35 = vmul.f32 1.442695, %v2070_v34 }
 0x253   : > { %911 = vmax.xlane.f32.xlu1 %v910_v33 }
 0x254   : > { %2336 = vpow2.f32 %v904_v35 }
 0x261   : > { %v2337_v42 = vpop.eup %2336 }
 0x262   : > { %v906_v43 = vadd.f32 1.0, %v2337_v42 }
 0x2c3   : > { %v1069_v36 = vpop.f32.mrf.mxu0 }
 0x2c4   : > { %v1073_v37 = vmul.f32 0.35355338, %v1069_v36  ;;  %v2074_v38 = vmul.f32 -0.35355338, %v1069_v36 }
 0x2c5   : > { %v2181_v39 = vpop.f32.mrf.mxu0 }
 0x2c6   : > { %v1075_v40 = vmul.f32 1.442695, %v2074_v38  ;;  %v1081_v41 = vsel %vm825_vm2, %v1073_v37, -inf }
 0x2c7   : > { %1082 = vmax.xlane.f32.xlu1 %v1081_v41 }
 0x2c8   : > { %2338 = vpow2.f32 %v1075_v40 }
 0x2c9   : > { %2340 = vrcp.f32 %v906_v43 }
 0x2d5   : > { %v2339_v44 = vpop.eup %2338 }
 0x2d6   : > { %v1077_v45 = vadd.f32 1.0, %v2339_v44  ;;  %v2341_v49 = vpop.eup %2340 }
 0x2d8   : > { %2342 = vrcp.f32 %v1077_v45 }
 0x2dc   : > { %v912_v46 = vpop.xlane.xlu1 %911 }
 0x2dd   : > { %v913_v47 = vsub.f32 %v902_v31, %v912_v46 }
 0x2df   : > { %v914_v48 = vmul.f32 1.442695, %v913_v47 }
 0x2e1   : > { %2344 = vpow2.f32 %v914_v48 }
 0x2e5   : > { %v2343_v50 = vpop.eup %2342 }
 0x2e6   : > { %v3052_v51 = vadd.f32 %v2343_v50, %v2341_v49 }
 0x2ee   : > { %v2345_v52 = vpop.eup %2344 }
 0x2ef   : > { %v916_v53 = vsel %vm825_vm2, %v2345_v52, 0.0 }
 0x2f0   : > { %917 = vadd.xlane.f32.xlu0 %v916_v53 }
 0x306   : > { %1413 = vrot.lane.b32.xlu0 %v3041_v26, %s2676_s13 }
 0x350   : > { %v1083_v54 = vpop.xlane.xlu1 %1082 }
 0x351   : > { %v1084_v55 = vsub.f32 %v1073_v37, %v1083_v54 }
 0x353   : > { %v1085_v56 = vmul.f32 1.442695, %v1084_v55  ;;  %v1737_v55 = vld [vmem:[#allocation13 + $0x18] sm:$0xff] }
 0x355   : > { %2346 = vpow2.f32 %v1085_v56 }
 0x362   : > { %v2347_v57 = vpop.eup %2346 }
 0x363   : > { %v1087_v58 = vsel %vm825_vm2, %v2347_v57, 0.0 }
 0x364   : > { %1088 = vadd.xlane.f32.xlu1 %v1087_v58 }
 0x375   : > { %1093 = vrot.lane.b32.xlu1 %v3041_v26, %s2675_s3 }
 0x379   : > { %v918_v59 = vpop.xlane.xlu0 %917  ;;  %1318 = vrot.lane.b32.xlu1 %v3023_v20, %s2676_s13 }
 0x37a   : > { %2348 = vrcp.f32 %v918_v59 }
 0x37d   : > { %1316 = vrot.lane.b32.xlu1 %v3025_v21, %s2676_s13  ;;  %v1414_v6 = vpop.permute.xlu0 %1413 }
 0x387   : > { %v2349_v60 = vpop.eup %2348 }
 0x388   : > { %v920_v61 = vmul.f32 %v2349_v60, %v2345_v52 }
 0x38a   : > { %2175 = vmatmul.mubr.msk.f32.vlgmr.msra.gmra.mxu1 %vm825_vm2, %v920_v61 }
 0x38b   : > { %2184 = vmatprep.mubr.msk.f32.mxu1 %vm2674_vm0, %v2673_v0 }
 0x3ed   : > { %v1089_v63 = vpop.xlane.xlu1 %1088 }
 0x3ee   : > { %2350 = vrcp.f32 %v1089_v63 }
 0x3f1   : > { %v1094_v1 = vpop.permute.xlu1 %1093 }
 0x3f2   : > { %2183 = vmatpush3.msra.mxu1 %v1094_v1 }
 0x3f3   : > { %2192 = vmatprep.subr.mxu1 %v2673_v0 }
 0x3f5   : > { %v1319_v8 = vpop.permute.xlu1 %1318 }
 0x3f9   : > { %v1317_v11 = vpop.permute.xlu1 %1316 }
 0x3fb   : > { %v2351_v2 = vpop.eup %2350 }
 0x3fc   : > { %v1091_v3 = vmul.f32 %v2351_v2, %v2347_v57 }
 0x3fe   : > { %2185 = vmatmul.mubr.msk.f32.vlgmr.msra.gmra.mxu1 %vm825_vm2, %v1091_v3 }
 0x3ff   : > { %2193 = vmatpush3.msra.mxu1 %v994_v4  ;;  %2194 = vmatprep.mubr.msk.f32.mxu1 %vm2674_vm0, %v2673_v0 }
 0x400   : > { %2202 = vmatprep.subr.mxu1 %v2673_v0 }
 0x44a   : > { %v990_v5 = vpop.f32.mrf.mxu1 }
 0x44b   : > { %2195 = vmatmul.mubr.msk.f32.vlgmr.msra.gmra.mxu1 %vm825_vm2, %v990_v5 }
 0x44c   : > { %2203 = vmatpush3.msra.mxu1 %v1414_v6  ;;  %v2176_v7 = vpop.f32.mrf.mxu1  ;;  %2204 = vmatprep.mubr.msk.f32.mxu1 %vm2674_vm0, %v2673_v0 }
 0x44d   : > { %2212 = vmatprep.subr.mxu1 %v2673_v0 }
 0x4be   : > { %v1165_v9 = vpop.f32.mrf.mxu1 }
 0x4bf   : > { %2190 = vmatmul.mubr.msk.f32.vlgmr.msra.gmra.mxu0 %vm825_vm2, %v1165_v9 }
 0x4c0   : > { %2198 = vmatpush3.xpose.msk.msra.mxu0 %vm825_vm2, %v1319_v8  ;;  %v2186_v10 = vpop.f32.mrf.mxu1  ;;  %2199 = vmatprep.mubr.msk.f32.mxu0 %vm2674_vm0, %v2673_v0 }
 0x4c1   : > { %2207 = vmatprep.subr.mxu0 %v2673_v0 }
 0x4c3   : > { %2200 = vmatmul.mubr.msk.f32.vlgmr.msra.gmra.mxu0 %vm825_vm2, %v1317_v11 }
 0x4c4   : > { %2209 = vmatprep.mubr.msk.f32.mxu0 %vm2674_vm0, %v2673_v0 }
 0x50b   : > { %v3082_v12 = vpop.f32.mrf.mxu1 }
 0x50d   : > { %v2196_v13 = vpop.f32.mrf.mxu1 }
 0x57f   : > { %v3084_v14 = vpop.f32.mrf.mxu0 }
 0x580   : > { %v1313_v56 = vadd.f32 %v3082_v12, %v3084_v14 }
 0x581   : > { %v2191_v15 = vpop.f32.mrf.mxu0 }
 0x583   : > { %v1390_v16 = vpop.f32.mrf.mxu0 }
 0x584   : > { %v1394_v17 = vmul.f32 0.35355338, %v1390_v16  ;;  %v2080_v18 = vmul.f32 -0.35355338, %v1390_v16 }
 0x585   : > { %v2201_v19 = vpop.f32.mrf.mxu0 }
 0x586   : > { %v1396_v22 = vmul.f32 1.442695, %v2080_v18  ;;  %v1402_v23 = vsel %vm825_vm2, %v1394_v17, -inf }
 0x587   : > { %1403 = vmax.xlane.f32.xlu1 %v1402_v23 }
 0x588   : > { %2352 = vpow2.f32 %v1396_v22 }
 0x595   : > { %v2353_v24 = vpop.eup %2352 }
 0x596   : > { %v1398_v25 = vadd.f32 1.0, %v2353_v24 }
 0x598   : > { %2354 = vrcp.f32 %v1398_v25 }
 0x5a5   : > { %v2355_v27 = vpop.eup %2354 }
 0x5a6   : > { %v1401_v28 = vadd.f32 %v2355_v27, %v3052_v51 }
 0x610   : > { %v1404_v29 = vpop.xlane.xlu1 %1403 }
 0x611   : > { %v1405_v30 = vsub.f32 %v1394_v17, %v1404_v29 }
 0x613   : > { %v1406_v31 = vmul.f32 1.442695, %v1405_v30 }
 0x615   : > { %2356 = vpow2.f32 %v1406_v31 }
 0x622   : > { %v2357_v32 = vpop.eup %2356 }
 0x623   : > { %v1408_v33 = vsel %vm825_vm2, %v2357_v32, 0.0 }
 0x624   : > { %1409 = vadd.xlane.f32.xlu0 %v1408_v33 }
 0x63a   : > { %1566 = vrot.lane.b32.xlu0 %v3023_v20, %s2677_s7  ;;  %v1489_v20 = vld [vmem:[#allocation13 + $0x10] sm:$0xff] }
 0x63b   : > { %2208 = vmatpush3.msra.mxu0 %v1489_v20 }
 0x63c   : > { %2217 = vmatprep.subr.mxu0 %v2673_v0 }
 0x63e   : > { %1564 = vrot.lane.b32.xlu0 %v3025_v21, %s2677_s7 }
 0x6ad   : > { %v1410_v34 = vpop.xlane.xlu0 %1409 }
 0x6ae   : > { %2358 = vrcp.f32 %v1410_v34 }
 0x6b1   : > { %v1567_v36 = vpop.permute.xlu0 %1566 }
 0x6b5   : > { %v1565_v38 = vpop.permute.xlu0 %1564 }
 0x6bb   : > { %v2359_v35 = vpop.eup %2358 }
 0x6bc   : > { %v1412_v37 = vmul.f32 %v2359_v35, %v2357_v32 }
 0x6be   : > { %2205 = vmatmul.mubr.msk.f32.vlgmr.msra.gmra.mxu1 %vm825_vm2, %v1412_v37 }
 0x6bf   : > { %2213 = vmatpush3.xpose.msk.msra.mxu1 %vm825_vm2, %v1567_v36  ;;  %2214 = vmatprep.mubr.msk.f32.mxu1 %vm2674_vm0, %v2673_v0 }
 0x6c0   : > { %2222 = vmatprep.subr.mxu1 %v2673_v0 }
 0x6c2   : > { %2215 = vmatmul.mubr.msk.f32.vlgmr.msra.gmra.mxu1 %vm825_vm2, %v1565_v38 }
 0x6c3   : > { %2224 = vmatprep.mubr.msk.f32.mxu1 %vm2674_vm0, %v2673_v0  ;;  %2223 = vmatpush3.msra.mxu1 %v1737_v55 }
 0x77e   : > { %v1485_v21 = vpop.f32.mrf.mxu1 }
 0x77f   : > { %2210 = vmatmul.mubr.msk.f32.vlgmr.msra.gmra.mxu0 %vm825_vm2, %v1485_v21 }
 0x780   : > { %v2206_v39 = vpop.f32.mrf.mxu1  ;;  %2219 = vmatprep.mubr.msk.f32.mxu0 %vm2674_vm0, %v2673_v0 }
 0x782   : > { %v1638_v40 = vpop.f32.mrf.mxu1 }
 0x783   : > { %v1642_v41 = vmul.f32 0.35355338, %v1638_v40  ;;  %v2085_v42 = vmul.f32 -0.35355338, %v1638_v40 }
 0x784   : > { %v2216_v43 = vpop.f32.mrf.mxu1 }
 0x785   : > { %v1644_v44 = vmul.f32 1.442695, %v2085_v42  ;;  %v1650_v45 = vsel %vm825_vm2, %v1642_v41, -inf }
 0x786   : > { %1651 = vmax.xlane.f32.xlu0 %v1650_v45 }
 0x787   : > { %2360 = vpow2.f32 %v1644_v44 }
 0x794   : > { %v2361_v46 = vpop.eup %2360 }
 0x795   : > { %v1646_v47 = vadd.f32 1.0, %v2361_v46 }
 0x797   : > { %2362 = vrcp.f32 %v1646_v47 }
 0x7a4   : > { %v2363_v48 = vpop.eup %2362 }
 0x7a5   : > { %v1649_v49 = vadd.f32 %v2363_v48, %v1401_v28 }
 0x7a7   : > { %v1822_v50 = vmul.f32 0.25, %v1649_v49 }
 0x7a9   : > { %1823 = vst.msk [vmem:[%s568_s14] sm:$0xff] %vm825_vm2, %v1822_v50 }
 0x80f   : > { %v1652_v51 = vpop.xlane.xlu0 %1651 }
 0x810   : > { %v1653_v0 = vsub.f32 %v1642_v41, %v1652_v51 }
 0x812   : > { %v1654_v52 = vmul.f32 1.442695, %v1653_v0 }
 0x814   : > { %2364 = vpow2.f32 %v1654_v52 }
 0x821   : > { %v2365_v53 = vpop.eup %2364 }
 0x822   : > { %v1656_v54 = vsel %vm825_vm2, %v2365_v53, 0.0 }
 0x823   : > { %1657 = vadd.xlane.f32.xlu1 %v1656_v54 }
 0x834   : > { %1661 = vrot.lane.b32.xlu1 %v3041_v26, %s2677_s7 }
 0x83f   : > { %v1559_v57 = vpop.f32.mrf.mxu0 }
 0x840   : > { %v1563_v58 = vadd.f32 %v1559_v57, %v1313_v56 }
 0x841   : > { %v2211_v59 = vpop.f32.mrf.mxu0 }
 0x8ac   : > { %v1658_v60 = vpop.xlane.xlu1 %1657 }
 0x8ad   : > { %2366 = vrcp.f32 %v1658_v60 }
 0x8b0   : > { %v1662_v61 = vpop.permute.xlu1 %1661 }
 0x8b1   : > { %2218 = vmatpush3.msra.mxu0 %v1662_v61 }
 0x8ba   : > { %v2367_v62 = vpop.eup %2366 }
 0x8bb   : > { %v1660_v63 = vmul.f32 %v2367_v62, %v2365_v53 }
 0x8bd   : > { %2220 = vmatmul.mubr.msk.f32.vlgmr.msra.gmra.mxu0 %vm825_vm2, %v1660_v63 }
 0x97d   : > { %v1733_v26 = vpop.f32.mrf.mxu0 }
 0x97e   : > { %2225 = vmatmul.mubr.msk.f32.vlgmr.msra.gmra.mxu1 %vm825_vm2, %v1733_v26 }
 0x97f   : > { %v2221_v1 = vpop.f32.mrf.mxu0 }
 0x980   : > { %2569 = shalt.err (!%p2566_p7)
}
 0x981   : > { %s2570_s12 = scalar_lea.hbm %s1854_s1, 128  ;;  %s2574_s16 = scalar_lea.hbm %s3245_s26, 256 }
 0x982   : > { %p2571_p3 = scmp.ne.s32.totalorder %s1854_s1, %s2570_s12  ;;  %p2575_p6 = scmp.lt.s32.totalorder %s1854_s1, %s3245_s26 }
 0x983   : > { %p2576_p9 = scmp.lt.s32.totalorder %s2574_s16, %s2570_s12 }
 0x984   : > { %p2572_p12 = pnand %p2571_p3, %p3246_p1 }
 0x985   : > { %p2577_p2 = por %p2576_p9, %p2575_p6 }
 0x986   : > { %p2573_p13 = pneg %p2572_p12 }
 0x988   : > { %p2578_p5 = pnand %p2577_p2, %p2573_p13 }
 0x98a   : > { %2581 = shalt.err (!%p2578_p5)
}
 0x98b   : > { %2250 = dma.vmem_to_hbm [thread:$0]  (%p3246_p1), %s1857_s21, 128, %s1854_s1, %s1830_s28  }
 0x98c   : > { %s3247_s30 = sld [smem:[#allocation32_spill]]  ;;  %s561_s29 = scalar_lea.vmem [#allocation14], %s2961_s24 }
 0x98d   : > { %s1843_s15 = sshll.u32 %s561_s29, 4  ;;  %s3248_s11 = sld [smem:[#allocation33_spill]]  ;;  %s1844_s15 = int_to_ptr.vmem [resolvable:$true] %s1843_s15 }
 0x98e   : > { %s1825_s18 = scalar_lea.sflag [#allocation4], %s2958_s0  ;;  %s2582_s1 = scalar_lea.vmem %s1844_s15, 128 }
 0x98f   : > { %p2583_p8 = scmp.ne.s32.totalorder %s1844_s15, %s2582_s1  ;;  %s2679_s21 = smov [#allocation14]  }
 0x990   : > { %s2586_s24 = sshll.u32 %s2679_s21, 4  ;;  %s2587_s24 = int_to_ptr.vmem [resolvable:$false] %s2586_s24 }
 0x991   : > { %p2584_p10 = pnand %p2583_p8, %p3246_p1  ;;  %s2588_s28 = scalar_lea.vmem %s2587_s24, 256 }
 0x992   : > { %v2088_v3 = vld [vmem:[%s3247_s30] ss:$0 sm:$0xff]  ;;  %p2589_p0 = scmp.lt.s32.totalorder %s1844_s15, %s2587_s24  ;;  %p2590_p4 = scmp.lt.s32.totalorder %s2588_s28, %s2582_s1 }
 0x993   : > { %s1841_s12 = scalar_lea.hbm %s3248_s11, %s2091_s17  ;;  %p2585_p11 = pneg %p2584_p10 }
 0x994   : > { %p2591_p7 = por %p2590_p4, %p2589_p0 }
 0x996   : > { %p2592_p3 = pnand %p2591_p7, %p2585_p11 }
 0xa3e   : > { %v1807_v2 = vpop.f32.mrf.mxu1 }
 0xa3f   : > { %v1811_v4 = vadd.f32 %v1807_v2, %v1563_v58 }
 0xa40   : > { %v2226_v5 = vpop.f32.mrf.mxu1 }
 0xa41   : > { %v1819_v6 = vadd.f32 %v2088_v3, %v1811_v4 }
 0xa43   : > { %1820 = vst.msk [vmem:[%s561_s29] sm:$0xff] %vm583_vm1, %v1819_v6 }
 0xa44   : > { %2595 = shalt.err (!%p2592_p3)
}
 0xa45   : > { %s2596_s27 = scalar_lea.hbm %s1841_s12, 128  ;;  %s2600_s3 = scalar_lea.hbm %s3248_s11, 256 }
 0xa46   : > { %p2597_p12 = scmp.ne.s32.totalorder %s1841_s12, %s2596_s27  ;;  %p2601_p9 = scmp.lt.s32.totalorder %s1841_s12, %s3248_s11 }
 0xa47   : > { %p2602_p2 = scmp.lt.s32.totalorder %s2600_s3, %s2596_s27 }
 0xa48   : > { %p2598_p13 = pnand %p2597_p12, %p3246_p1 }
 0xa49   : > { %p2603_p5 = por %p2602_p2, %p2601_p9 }
 0xa4a   : > { %p2599_p6 = pneg %p2598_p13 }
 0xa4c   : > { %p2604_p8 = pnand %p2603_p5, %p2599_p6 }
 0xa4e   : > { %2607 = shalt.err (!%p2604_p8)
}
 0xa4f   : > { %2249 = dma.vmem_to_hbm [thread:$0]  (%p3246_p1), %s1844_s15, 128, %s1841_s12, %s1825_s18  }
 0xa50 PF: > { %s3249_s13 = sld [smem:[#allocation23_spill]] }
 0xa51   : > { %s3250_s7 = sld [smem:[#allocation27_spill]] }
 0xa52   : > { %s3251_s14 = sld [smem:[#allocation24_spill]] }
 0xa56   : > { %s1868_s30 = sand.u32 1, %s3249_s13  }
 0xa57   : > { %p3252_p10 = scmp.ne.s32.totalorder %s3250_s7, 0  ;;  %s1869_s29 = scalar_lea.sflag [#allocation4], %s1868_s30 }
 0xa58   : > { %p3253_p11 = scmp.ge.s32.totalorder %s3251_s14, 2 }
 0xa5a   : > { %p2277_p0 = pnand %p3253_p11, %p3252_p10 }
 0xa5c   : > { %p2278_p4 = pneg %p2277_p0 }
 0xa5e   : > { %2641 = dma.done.wait (%p2278_p4), %s1869_s29, 128  }
 0xa5f   : > { %2643 = vsyncadd (%p2278_p4), %s1869_s29, 4294967168  ;;  %s1878_s25 = scalar_lea.sflag [#allocation16], %s1868_s30 }
 0xa60   : > { %2645 = dma.done.wait (%p2278_p4), %s1878_s25, 128  }
 0xa61   : > { %2647 = vsyncadd (%p2278_p4), %s1878_s25, 4294967168  ;;  %s3254_s24 = sld [smem:[#allocation25_spill]]  ;;  %s3256_s21 = smov %s2654_s22 }
 0xa62   : > { %s3255_s20 = sld [smem:[#allocation26_spill]]  ;;  %s3257_s22 = smov %s2658_s23 }
 0xa67   : > { %p34_p1 = scmp.ge.s32.totalorder %s3254_s24, 4  }
 0xa68   : > { %s3258_s23 = smov %s3255_s20 }
 0xa69   :  { %36 = sbr.rel (!%p34_p1) target bundleno = 19 (0x13), region = 166 }
 0xa6e   :  { %1883 = vsyncpa [#allocation3], 1 }
 0xa6f   :  { %1885 = vsyncpa [#allocation3 + $0x1], 1 }
 0xa70   :  { %1886 = vsyncpa [#allocation6], 1 }
 0xa71   :  { %1888 = vsyncpa [#allocation6 + $0x1], 1 }
 0xa72   :  { %1889 = vsyncpa [#allocation9], 1 }
 0xa73   :  { %1890 = vsyncpa [#allocation12], 1 }
 0xa74   :  { %1891 = vsyncpa [#allocation4], 1 }
 0xa75   :  { %1893 = vsyncpa [#allocation4 + $0x1], 1 }
 0xa76   :  { %1894 = vsyncpa [#allocation16], 1 }
 0xa77   :  { %1896 = vsyncpa [#allocation16 + $0x1], 1 }

</bundles_post_ra>
